<compile_context>
chip_gen: v7x
topology: tpu7x:2x2x1
jax: 0.10.0
libtpu: 0.0.40
codegen_flags: <defaults>
</compile_context>

<pallas_src>
import functools

import numpy as np
import jax
import jax.numpy as jnp
from jax import lax
from jax.experimental import pallas as pl
from jax.experimental.pallas import tpu as pltpu

DILATIONS = (1, 2, 4)
# Distinct row shifts dy = (ky-1)*d over all (branch, ky); width shifts are folded
# into the weights, so these 7 shifts are the only taps left.
DY_LIST = tuple(sorted({(ky - 1) * d for d in DILATIONS for ky in range(3)}))  # (-4,-2,-1,0,1,2,4)
PADV = 8  # vertical zero-pad rows: >= max|dy| (4), rounded up to a sublane multiple


# --------------------------------- kernel ---------------------------------
def mbd_kernel(x_ref, mpw_ref, bpw_ref, md_ref, bc_ref, o_ref, pad_ref, col_ref,
               *, Bt, H):
    P = PADV
    Hp = H + 2 * P
    WC = bc_ref.shape[-1]

    # (1) Pointwise 1x1 conv: ONE big-M matmul over the whole batch block,
    #     bias added once as a broadcast row.
    pw = jnp.dot(x_ref[...], mpw_ref[...],
                 preferred_element_type=jnp.float32) + bpw_ref[...]

    # (2) Vertically zero-padded, image-stacked buffer.  Interior of image b
    #     starts at b*Hp + P (a sublane multiple since H % 8 == 0, P == 8), so
    #     these stores are unmasked.  Borders are re-zeroed every step because
    #     the scratch is reused across "parallel" grid steps.
    zeros_p = jnp.zeros((P, WC), jnp.float32)
    for b in range(Bt):
        base = b * Hp
        pad_ref[base:base + P, :] = zeros_p
        pad_ref[base + P:base + P + H, :] = pw[b * H:(b + 1) * H, :]
        pad_ref[base + P + H:base + Hp, :] = zeros_p

    # (3) im2col: the 7 row-shifted views go into lane-dense 128-wide column
    #     blocks of a (Bt*H, 7*WC) buffer.  dy, b are Python constants, so all
    #     slices are static.  (Loads start at P+dy, not sublane-aligned; the
    #     cost is modest at H = 16.  TODO(synk): use pltpu.roll on the sublane
    #     axis of the stacked pad buffer once H is tiled larger.)
    for i, dy in enumerate(DY_LIST):
        for b in range(Bt):
            src = b * Hp + P + dy
            col_ref[b * H:(b + 1) * H, i * WC:(i + 1) * WC] = pad_ref[src:src + H, :]

    # (4) ONE K = 7*WC matmul covering all three dilated branches and the
    #     fusion 1x1 (folded host-side), plus the combined bias row.
    o_ref[...] = (jnp.dot(col_ref[...], md_ref[...],
                          preferred_element_type=jnp.float32)
                  + bc_ref[...]).astype(o_ref.dtype)


# --------------------------------- wrapper ---------------------------------
def _round_up(n, m):
    return ((n + m - 1) // m) * m


def _pick_batch_block(B, H, target_m=256, min_steps=2):
    """Keep >= min_steps grid steps when possible (both v7x TensorCores busy
    under "parallel" semantics) while pushing the matmul M dim (Bt*H) toward
    target_m so the MXU rows are filled."""
    divisors = [d for d in range(1, B + 1) if B % d == 0]
    good = [d for d in divisors if B // d >= min_steps and d * H >= target_m]
    if good:
        return min(good)
    ok = [d for d in divisors if B // d >= min_steps]
    if ok:
        return max(ok)
    return B


def mbd_forward(x2d, m_pw, b_pw_row, md_stack, b_comb_row, *, batch_block=None):
    """x2d: (B, H, W*C_in) f32 (NHWC with W and C folded into the lane axis).
    Returns (B, H, W*C_out) f32."""
    B, H, WCi = x2d.shape
    WCi_pad, WC = m_pw.shape
    n_dy = len(DY_LIST)
    assert md_stack.shape == (n_dy * WC, WC)
    assert H % 8 == 0, "interiors must stay sublane-aligned"  # TODO(synk): pad H if needed

    if batch_block is None:
        batch_block = _pick_batch_block(B, H)
    Bt = batch_block
    assert B % Bt == 0

    # Lane-dense pointwise K: zero-pad the folded input channels (e.g. 64 -> 128).
    if WCi_pad != WCi:
        x2d = jnp.pad(x2d, ((0, 0), (0, 0), (0, WCi_pad - WCi)))

    # Stack images along the sublane axis -> big-M operands, dense output stores.
    x_flat = x2d.reshape(B * H, WCi_pad)
    Hp = H + 2 * PADV

    kern = functools.partial(mbd_kernel, Bt=Bt, H=H)

    grid_spec = pltpu.PrefetchScalarGridSpec(
        num_scalar_prefetch=0,
        grid=(B // Bt,),
        in_specs=[
            pl.BlockSpec((Bt * H, WCi_pad), lambda i: (i, 0)),   # x, stacked + lane-dense
            # TODO(synk): when W grows, add pipeline_mode=pl.Buffered(1) on the
            # constant-index weight/bias specs and set vmem_limit_bytes for v7x.
            pl.BlockSpec((WCi_pad, WC), lambda i: (0, 0)),       # block-diag pointwise weight
            pl.BlockSpec((1, WC), lambda i: (0, 0)),             # pointwise bias row
            pl.BlockSpec((n_dy * WC, WC), lambda i: (0, 0)),     # stacked folded tap weights
            pl.BlockSpec((1, WC), lambda i: (0, 0)),             # combined output bias row
        ],
        out_specs=pl.BlockSpec((Bt * H, WC), lambda i: (i, 0)),
        scratch_shapes=[
            pltpu.VMEM((Bt * Hp, WC), jnp.float32),              # padded pointwise output
            pltpu.VMEM((Bt * H, n_dy * WC), jnp.float32),        # im2col buffer (K = 7*WC)
        ],
    )

    out_flat = pl.pallas_call(
        kern,
        out_shape=jax.ShapeDtypeStruct((B * H, WC), jnp.float32),
        grid_spec=grid_spec,
        compiler_params=pltpu.CompilerParams(
            dimension_semantics=("parallel",)),
    )(x_flat, m_pw, b_pw_row, md_stack, b_comb_row)

    return out_flat.reshape(B, H, WC)


# --------------------- one-time weight preprocessing (host glue) ---------------------
def prepare_mbd_params(pw_w, pw_b, d_ws, d_bs, f_w, f_b, W):
    """Fold fusion into the dilated weights, bake width shifts / padding into
    block-structured matrices, stack them per row shift dy, and zero-pad the
    pointwise K dim to a lane multiple.  PyTorch OIHW layout in."""
    C_out, C_in = pw_w.shape[0], pw_w.shape[1]
    WC = W * C_out
    WCi = W * C_in
    WCi_pad = _round_up(WCi, 128)

    wpw = np.asarray(pw_w, np.float64)[:, :, 0, 0].T                 # (C_in, C_out)
    fw2 = np.asarray(f_w, np.float64)[:, :, 0, 0]                    # (C_out, 3*C_out)

    # Pointwise 1x1 as a block-diagonal (W*C_in, W*C_out) matmul, K padded to 128.
    m_pw = np.zeros((WCi_pad, WC), np.float64)
    m_pw[:WCi, :] = np.kron(np.eye(W), wpw)
    b_pw_row = np.tile(np.asarray(pw_b, np.float64), W)[None, :]

    # Folded dilated + fusion weights, merged per distinct row shift dy.
    m_d = np.zeros((len(DY_LIST), WC, WC), np.float64)
    b_comb = np.asarray(f_b, np.float64).copy()
    for bi, d in enumerate(DILATIONS):
        wf_bi = fw2[:, bi * C_out:(bi + 1) * C_out].T                # (C_branch_in, C_final)
        wd = np.asarray(d_ws[bi], np.float64)                        # (cb, ci, ky, kx) OIHW
        # w_comb[ky, kx, ci, co] = sum_cb wd[cb, ci, ky, kx] * wf_bi[cb, co]
        wcomb = np.einsum('aikl,ao->klio', wd, wf_bi)
        b_comb = b_comb + np.asarray(d_bs[bi], np.float64) @ wf_bi
        for ky in range(3):
            di = DY_LIST.index((ky - 1) * d)
            for kx in range(3):
                dx = (kx - 1) * d
                # eye(W, k=-dx)[w_in, w_out] = 1 iff w_in == w_out + dx; missing
                # blocks at the edges give exact horizontal zero padding.
                m_d[di] += np.kron(np.eye(W, k=-dx), wcomb[ky, kx])
    b_comb_row = np.tile(b_comb, W)[None, :]

    # Stack the 7 per-dy matrices along K so the kernel does one K=7*WC dot.
    md_stack = m_d.reshape(len(DY_LIST) * WC, WC)

    return (jnp.asarray(m_pw, jnp.float32), jnp.asarray(b_pw_row, jnp.float32),
            jnp.asarray(md_stack, jnp.float32), jnp.asarray(b_comb_row, jnp.float32))


# ---------------------------- pure-JAX reference (PyTorch semantics) ----------------------------
def mbd_reference_nchw(x, pw_w, pw_b, d_ws, d_bs, f_w, f_b):
    def conv(x, w, b, pad, dil):
        y = lax.conv_general_dilated(
            x, w, window_strides=(1, 1), padding=((pad, pad), (pad, pad)),
            rhs_dilation=(dil, dil), dimension_numbers=('NCHW', 'OIHW', 'NCHW'),
            precision=lax.Precision.HIGHEST)
        return y + b[None, :, None, None]

    y = conv(x, pw_w, pw_b, 0, 1)
    outs = [conv(y, d_ws[i], d_bs[i], d, d) for i, d in enumerate(DILATIONS)]
    cat = jnp.concatenate(outs, axis=1)
    return conv(cat, f_w, f_b, 0, 1)


if __name__ == "__main__":
    B, C_in, C_out, H, W = 2, 4, 8, 16, 16   # W*C_out == 128 -> fully lane-dense

    key = jax.random.PRNGKey(0)
    keys = jax.random.split(key, 10)

    # PyTorch-style parameters (OIHW weights), deterministic init.
    x_nchw = jax.random.normal(keys[0], (B, C_in, H, W), jnp.float32)
    pw_w = 0.1 * jax.random.normal(keys[1], (C_out, C_in, 1, 1), jnp.float32)
    pw_b = 0.1 * jax.random.normal(keys[2], (C_out,), jnp.float32)
    d_ws = [0.1 * jax.random.normal(keys[3 + i], (C_out, C_out, 3, 3), jnp.float32)
            for i in range(3)]
    d_bs = [0.1 * jax.random.normal(keys[6 + i], (C_out,), jnp.float32)
            for i in range(3)]
    f_w = 0.1 * jax.random.normal(keys[9], (C_out, 3 * C_out, 1, 1), jnp.float32)
    f_b = jnp.linspace(-0.1, 0.1, C_out, dtype=jnp.float32)

    # Kernel-layout input: NCHW -> NHWC -> (B, H, W*C_in)  (lane-dense last axis).
    x2d = jnp.transpose(x_nchw, (0, 2, 3, 1)).reshape(B, H, W * C_in)
    m_pw, b_pw_row, md_stack, b_comb_row = prepare_mbd_params(
        pw_w, pw_b, d_ws, d_bs, f_w, f_b, W)

    out2d = mbd_forward(x2d, m_pw, b_pw_row, md_stack, b_comb_row)
    out2d = jax.block_until_ready(out2d)
    out_nhwc = out2d.reshape(B, H, W, C_out)

    ref_nchw = mbd_reference_nchw(x_nchw, pw_w, pw_b, d_ws, d_bs, f_w, f_b)
    ref_nhwc = jnp.transpose(ref_nchw, (0, 2, 3, 1))

    assert out_nhwc.shape == (B, H, W, C_out)
    max_err = float(jnp.max(jnp.abs(out_nhwc - ref_nhwc)))
    assert jnp.allclose(out_nhwc, ref_nhwc, atol=2e-3, rtol=2e-3), max_err
    print("KERNEL_OK")
</pallas_src>

<mosaic_0001>
module attributes {stable_mosaic.version = 11 : i64} {
  func.func @mbd_kernel(%arg0: i32, %arg1: memref<16x128xf32, #tpu.memory_space<vmem>>, %arg2: memref<128x128xf32, #tpu.memory_space<vmem>>, %arg3: memref<1x128xf32, #tpu.memory_space<vmem>>, %arg4: memref<896x128xf32, #tpu.memory_space<vmem>>, %arg5: memref<1x128xf32, #tpu.memory_space<vmem>>, %arg6: memref<16x128xf32, #tpu.memory_space<vmem>>, %arg7: memref<32x128xf32, #tpu.memory_space<vmem>>, %arg8: memref<16x896xf32, #tpu.memory_space<vmem>>) attributes {dimension_semantics = [#tpu.dimension_semantics<parallel>], iteration_bounds = array<i64: 2>, scalar_prefetch = 0 : i64, scratch_operands = 2 : i64, tpu.core_type = #tpu.core_type<tc>, window_params = [{transform_indices = @transform_0, window_bounds = array<i64: 16, 128>}, {pipeline_mode = #tpu.pipeline_mode<synchronous>, transform_indices = @transform_1, window_bounds = array<i64: 128, 128>}, {pipeline_mode = #tpu.pipeline_mode<synchronous>, transform_indices = @transform_2, window_bounds = array<i64: 1, 128>}, {pipeline_mode = #tpu.pipeline_mode<synchronous>, transform_indices = @transform_3, window_bounds = array<i64: 896, 128>}, {pipeline_mode = #tpu.pipeline_mode<synchronous>, transform_indices = @transform_4, window_bounds = array<i64: 1, 128>}, {transform_indices = @transform_5, window_bounds = array<i64: 16, 128>}]} {
    %c0 = arith.constant 0 : index
    %c0_0 = arith.constant 0 : index
    %0 = vector.load %arg1[%c0, %c0_0] : memref<16x128xf32, #tpu.memory_space<vmem>>, vector<16x128xf32>
    %c0_1 = arith.constant 0 : index
    %c0_2 = arith.constant 0 : index
    %1 = vector.load %arg2[%c0_1, %c0_2] : memref<128x128xf32, #tpu.memory_space<vmem>>, vector<128x128xf32>
    %cst = arith.constant dense<0.000000e+00> : vector<16x128xf32>
    %2 = tpu.matmul %0, %1, %cst {dimension_numbers = #tpu.dot_dimension_numbers<[1], [0], [0], [1], [0, 0, 1, 1], [], []>} : vector<16x128xf32>, vector<128x128xf32>, vector<16x128xf32> -> vector<16x128xf32>
    %c0_3 = arith.constant 0 : index
    %c0_4 = arith.constant 0 : index
    %3 = vector.load %arg3[%c0_3, %c0_4] : memref<1x128xf32, #tpu.memory_space<vmem>>, vector<1x128xf32>
    %4 = vector.broadcast %3 : vector<1x128xf32> to vector<16x128xf32>
    %5 = arith.addf %2, %4 : vector<16x128xf32>
    %cst_5 = arith.constant 0.000000e+00 : f32
    %6 = vector.broadcast %cst_5 : f32 to vector<8x128xf32>
    %c0_6 = arith.constant 0 : index
    %c0_7 = arith.constant 0 : index
    %7 = vector.load %arg7[%c0_6, %c0_7] : memref<32x128xf32, #tpu.memory_space<vmem>>, vector<8x128xf32>
    tpu.vector_store %arg7[%c0_6, %c0_7], %6 {strides = array<i32>} : memref<32x128xf32, #tpu.memory_space<vmem>>, vector<8x128xf32>,
    %c8 = arith.constant 8 : index
    %c0_8 = arith.constant 0 : index
    %8 = vector.load %arg7[%c8, %c0_8] : memref<32x128xf32, #tpu.memory_space<vmem>>, vector<16x128xf32>
    tpu.vector_store %arg7[%c8, %c0_8], %5 {strides = array<i32>} : memref<32x128xf32, #tpu.memory_space<vmem>>, vector<16x128xf32>,
    %c24 = arith.constant 24 : index
    %c0_9 = arith.constant 0 : index
    %9 = vector.load %arg7[%c24, %c0_9] : memref<32x128xf32, #tpu.memory_space<vmem>>, vector<8x128xf32>
    tpu.vector_store %arg7[%c24, %c0_9], %6 {strides = array<i32>} : memref<32x128xf32, #tpu.memory_space<vmem>>, vector<8x128xf32>,
    %c4 = arith.constant 4 : index
    %c0_10 = arith.constant 0 : index
    %10 = vector.load %arg7[%c4, %c0_10] : memref<32x128xf32, #tpu.memory_space<vmem>>, vector<16x128xf32>
    %c0_11 = arith.constant 0 : index
    %c0_12 = arith.constant 0 : index
    %11 = vector.load %arg8[%c0_11, %c0_12] : memref<16x896xf32, #tpu.memory_space<vmem>>, vector<16x128xf32>
    tpu.vector_store %arg8[%c0_11, %c0_12], %10 {strides = array<i32>} : memref<16x896xf32, #tpu.memory_space<vmem>>, vector<16x128xf32>,
    %c6 = arith.constant 6 : index
    %c0_13 = arith.constant 0 : index
    %12 = vector.load %arg7[%c6, %c0_13] : memref<32x128xf32, #tpu.memory_space<vmem>>, vector<16x128xf32>
    %c0_14 = arith.constant 0 : index
    %c128 = arith.constant 128 : index
    %13 = vector.load %arg8[%c0_14, %c128] : memref<16x896xf32, #tpu.memory_space<vmem>>, vector<16x128xf32>
    tpu.vector_store %arg8[%c0_14, %c128], %12 {strides = array<i32>} : memref<16x896xf32, #tpu.memory_space<vmem>>, vector<16x128xf32>,
    %c7 = arith.constant 7 : index
    %c0_15 = arith.constant 0 : index
    %14 = vector.load %arg7[%c7, %c0_15] : memref<32x128xf32, #tpu.memory_space<vmem>>, vector<16x128xf32>
    %c0_16 = arith.constant 0 : index
    %c256 = arith.constant 256 : index
    %15 = vector.load %arg8[%c0_16, %c256] : memref<16x896xf32, #tpu.memory_space<vmem>>, vector<16x128xf32>
    tpu.vector_store %arg8[%c0_16, %c256], %14 {strides = array<i32>} : memref<16x896xf32, #tpu.memory_space<vmem>>, vector<16x128xf32>,
    %c8_17 = arith.constant 8 : index
    %c0_18 = arith.constant 0 : index
    %16 = vector.load %arg7[%c8_17, %c0_18] : memref<32x128xf32, #tpu.memory_space<vmem>>, vector<16x128xf32>
    %c0_19 = arith.constant 0 : index
    %c384 = arith.constant 384 : index
    %17 = vector.load %arg8[%c0_19, %c384] : memref<16x896xf32, #tpu.memory_space<vmem>>, vector<16x128xf32>
    tpu.vector_store %arg8[%c0_19, %c384], %16 {strides = array<i32>} : memref<16x896xf32, #tpu.memory_space<vmem>>, vector<16x128xf32>,
    %c9 = arith.constant 9 : index
    %c0_20 = arith.constant 0 : index
    %18 = vector.load %arg7[%c9, %c0_20] : memref<32x128xf32, #tpu.memory_space<vmem>>, vector<16x128xf32>
    %c0_21 = arith.constant 0 : index
    %c512 = arith.constant 512 : index
    %19 = vector.load %arg8[%c0_21, %c512] : memref<16x896xf32, #tpu.memory_space<vmem>>, vector<16x128xf32>
    tpu.vector_store %arg8[%c0_21, %c512], %18 {strides = array<i32>} : memref<16x896xf32, #tpu.memory_space<vmem>>, vector<16x128xf32>,
    %c10 = arith.constant 10 : index
    %c0_22 = arith.constant 0 : index
    %20 = vector.load %arg7[%c10, %c0_22] : memref<32x128xf32, #tpu.memory_space<vmem>>, vector<16x128xf32>
    %c0_23 = arith.constant 0 : index
    %c640 = arith.constant 640 : index
    %21 = vector.load %arg8[%c0_23, %c640] : memref<16x896xf32, #tpu.memory_space<vmem>>, vector<16x128xf32>
    tpu.vector_store %arg8[%c0_23, %c640], %20 {strides = array<i32>} : memref<16x896xf32, #tpu.memory_space<vmem>>, vector<16x128xf32>,
    %c12 = arith.constant 12 : index
    %c0_24 = arith.constant 0 : index
    %22 = vector.load %arg7[%c12, %c0_24] : memref<32x128xf32, #tpu.memory_space<vmem>>, vector<16x128xf32>
    %c0_25 = arith.constant 0 : index
    %c768 = arith.constant 768 : index
    %23 = vector.load %arg8[%c0_25, %c768] : memref<16x896xf32, #tpu.memory_space<vmem>>, vector<16x128xf32>
    tpu.vector_store %arg8[%c0_25, %c768], %22 {strides = array<i32>} : memref<16x896xf32, #tpu.memory_space<vmem>>, vector<16x128xf32>,
    %c0_26 = arith.constant 0 : index
    %c0_27 = arith.constant 0 : index
    %24 = vector.load %arg8[%c0_26, %c0_27] : memref<16x896xf32, #tpu.memory_space<vmem>>, vector<16x896xf32>
    %c0_28 = arith.constant 0 : index
    %c0_29 = arith.constant 0 : index
    %25 = vector.load %arg4[%c0_28, %c0_29] : memref<896x128xf32, #tpu.memory_space<vmem>>, vector<896x128xf32>
    %cst_30 = arith.constant dense<0.000000e+00> : vector<16x128xf32>
    %26 = tpu.matmul %24, %25, %cst_30 {dimension_numbers = #tpu.dot_dimension_numbers<[1], [0], [0], [1], [0, 0, 1, 1], [], []>} : vector<16x896xf32>, vector<896x128xf32>, vector<16x128xf32> -> vector<16x128xf32>
    %c0_31 = arith.constant 0 : index
    %c0_32 = arith.constant 0 : index
    %27 = vector.load %arg5[%c0_31, %c0_32] : memref<1x128xf32, #tpu.memory_space<vmem>>, vector<1x128xf32>
    %28 = vector.broadcast %27 : vector<1x128xf32> to vector<16x128xf32>
    %29 = arith.addf %26, %28 : vector<16x128xf32>
    %c0_33 = arith.constant 0 : index
    %c0_34 = arith.constant 0 : index
    %30 = vector.load %arg6[%c0_33, %c0_34] : memref<16x128xf32, #tpu.memory_space<vmem>>, vector<16x128xf32>
    tpu.vector_store %arg6[%c0_33, %c0_34], %29 {strides = array<i32>} : memref<16x128xf32, #tpu.memory_space<vmem>>, vector<16x128xf32>,
    return
  }
  func.func @transform_0(%arg0: i32) -> (i32, i32) {
    %c0_i32 = arith.constant 0 : i32
    %c0_i32_0 = arith.constant 0 : i32
    return %arg0, %c0_i32 : i32, i32
  }
  func.func @transform_1(%arg0: i32) -> (i32, i32) {
    %c0_i32 = arith.constant 0 : i32
    %c0_i32_0 = arith.constant 0 : i32
    %c0_i32_1 = arith.constant 0 : i32
    return %c0_i32, %c0_i32_0 : i32, i32
  }
  func.func @transform_2(%arg0: i32) -> (i32, i32) {
    %c0_i32 = arith.constant 0 : i32
    %c0_i32_0 = arith.constant 0 : i32
    %c0_i32_1 = arith.constant 0 : i32
    return %c0_i32, %c0_i32_0 : i32, i32
  }
  func.func @transform_3(%arg0: i32) -> (i32, i32) {
    %c0_i32 = arith.constant 0 : i32
    %c0_i32_0 = arith.constant 0 : i32
    %c0_i32_1 = arith.constant 0 : i32
    return %c0_i32, %c0_i32_0 : i32, i32
  }
  func.func @transform_4(%arg0: i32) -> (i32, i32) {
    %c0_i32 = arith.constant 0 : i32
    %c0_i32_0 = arith.constant 0 : i32
    %c0_i32_1 = arith.constant 0 : i32
    return %c0_i32, %c0_i32_0 : i32, i32
  }
  func.func @transform_5(%arg0: i32) -> (i32, i32) {
    %c0_i32 = arith.constant 0 : i32
    %c0_i32_0 = arith.constant 0 : i32
    return %arg0, %c0_i32 : i32, i32
  }
}

</mosaic_0001>

<bundles_post_ra>
// kernel: tpu_custom_call.1
= control target key start
LH: loop header
LB: loop body
LE: loop exit
PB: predicated region body
PF: predicated region fallthrough
CT: control target
= control target key end

     0   :  { %10 = vsyncpa [#allocation5], 0  ;;  %s1875_s0 = inlined_call_operand.hbm [shape: f32[32,128], index: 0, kind: input, shape index: {}]   ;;  %s1876_s1 = inlined_call_operand.hbm [shape: f32[128,128], index: 1, kind: input, shape index: {}]   ;;  %s1877_s2 = inlined_call_operand.vmem [shape: f32[1,128], index: 2, kind: input, shape index: {}]   ;;  %s1878_s3 = inlined_call_operand.hbm [shape: f32[896,128], index: 3, kind: input, shape index: {}]   ;;  %s1879_s4 = inlined_call_operand.vmem [shape: f32[1,128], index: 4, kind: input, shape index: {}]   ;;  %s1880_s5 = inlined_call_operand.hbm [shape: f32[32,128], index: 5, kind: output, shape index: {}]  }
   0x1   :  { %12 = vsyncpa [#allocation5 + $0x1], 0 }
   0x2   :  { %13 = vsyncpa [#allocation8], 0 }
   0x3   :  { %14 = vsyncpa [#allocation6], 0 }
   0x4   :  { %16 = vsyncpa [#allocation6 + $0x1], 0  ;;  %s1618_s18 = smov 0   ;;  %s1620_s19 = smov 0  }
   0x5   :  { %s1622_s20 = smov 0   ;;  %s1624_s21 = smov 0  }
   0x6 LB: > { %s1639_s22 = sadd.s32 4294967295, %s1577_s21   ;;  %s947_s23 = sadd.s32 4294967294, %s1577_s21   ;;  %s1577_s21 = sphi %s1624_s21, %s1900_s21   ;;  %s1573_s20 = sphi %s1622_s20, %s1899_s20   ;;  %s1569_s19 = sphi %s1620_s19, %s1898_s19   ;;  %s1565_s18 = sphi %s1618_s18, %s1897_s18  }
   0x7   : > { %p42_p0 = scmp.ne.s32.totalorder %s1569_s19, %s1565_s18  ;;  %p1881_p1 = scmp.eq.s32.totalorder %s1639_s22, 0 }
   0x8   : > { %p156_p3 = scmp.eq.s32.totalorder %s947_s23, 1  ;;  %p948_p5 = scmp.ge.s32.totalorder %s1577_s21, 1 }
   0x9   : > { %p1648_p4 = por %p1881_p1, %p42_p0  ;;  %p163_p7 = scmp.lt.s32.totalorder %s1577_s21, 3 }
   0xa   : > { %p1653_p6 = por %p156_p3, %p42_p0  ;;  %s1579_s27 = smov [#allocation7]  }
   0xb   : > { %s1884_s24 = scalar_select %p1648_p4, 1, 0 }
   0xc   : > { %s1885_s25 = scalar_select %p1653_p6, 1, 0 }
   0xd   : > { %p1658_p8 = pnand %p948_p5, %p163_p7  ;;  %s175_s28 = sshll.u32 %s1579_s27, 4  ;;  %s1662_s28 = int_to_ptr.vmem [resolvable:$true] %s175_s28 }
   0xe   : > { %s1580_s30 = smov [#allocation9]   ;;  %s1421_s9 = scalar_lea.hbm %s1876_s1, 2048 }
   0xf   : > { %p1361_p9 = pneg %p1658_p8  ;;  %s191_s6 = sshll.u32 %s1580_s30, 4  ;;  %s1673_s6 = int_to_ptr.vmem [resolvable:$true] %s191_s6 }
  0x10   : > { %p1422_p12 = scmp.ne.s32.totalorder %s1876_s1, %s1421_s9  ;;  %p1428_p5 = scmp.lt.u32.totalorder %s1421_s9, %s1876_s1 }
  0x11   : > { %p1669_p11 = pnand %p1361_p9, %p1881_p1 }
  0x13   : > { %p1423_p13 = pneg %p1669_p11 }
  0x15   : > { %p1424_p0 = pnand %p1423_p13, %p1422_p12 }
  0x17   : > { %p1425_p3 = pneg %p1424_p0 }
  0x19   : > { %p1430_p7 = pnand %p1428_p5, %p1425_p3 }
  0x1b   : > { %1433 = shalt.err (!%p1430_p7)
}
  0x1c   : > { %s1434_s14 = scalar_lea.vmem %s1662_s28, 2048  ;;  %p1442_p2 = scmp.lt.s32.totalorder %s1662_s28, %s1662_s28 }
  0x1d   : > { %p1435_p9 = scmp.ne.s32.totalorder %s1662_s28, %s1434_s14  ;;  %p1443_p12 = scmp.lt.s32.totalorder %s1434_s14, %s1434_s14 }
  0x1f   : > { %p1437_p10 = pnand %p1435_p9, %p1423_p13  ;;  %p1444_p0 = por %p1443_p12, %p1442_p2 }
  0x21   : > { %p1438_p1 = pneg %p1437_p10 }
  0x23   : > { %p1445_p6 = pnand %p1444_p0, %p1438_p1 }
  0x25   : > { %1448 = shalt.err (!%p1445_p6)
}
  0x26   : > { %s1581_s15 = smov 128   ;;  %s1582_s16 = smov 8  }
  0x27   : > { %1364 = dma.hbm_to_vmem [thread:$0]  (!%p1669_p11), %s1876_s1, 2048, %s1662_s28, [#allocation8], %s1581_s15, %s1581_s15, %s1582_s16  }
  0x28   : > { %s1449_s7 = scalar_lea.hbm %s1878_s3, 14336 }
  0x29   : > { %p1450_p1 = scmp.ne.s32.totalorder %s1878_s3, %s1449_s7  ;;  %p1456_p10 = scmp.lt.u32.totalorder %s1449_s7, %s1878_s3 }
  0x2b   : > { %p1452_p2 = pnand %p1450_p1, %p1423_p13 }
  0x2d   : > { %p1453_p6 = pneg %p1452_p2 }
  0x2f   : > { %p1458_p3 = pnand %p1456_p10, %p1453_p6 }
  0x31   : > { %1461 = shalt.err (!%p1458_p3)
}
  0x32   : > { %s1462_s28 = scalar_lea.vmem %s1673_s6, 14336  ;;  %p1470_p12 = scmp.lt.s32.totalorder %s1673_s6, %s1673_s6 }
  0x33   : > { %p1463_p5 = scmp.ne.s32.totalorder %s1673_s6, %s1462_s28  ;;  %p1471_p0 = scmp.lt.s32.totalorder %s1462_s28, %s1462_s28 }
  0x35   : > { %p1465_p7 = pnand %p1463_p5, %p1423_p13  ;;  %p1472_p1 = por %p1471_p0, %p1470_p12 }
  0x37   : > { %p1466_p9 = pneg %p1465_p7 }
  0x39   : > { %p1473_p2 = pnand %p1472_p1, %p1466_p9 }
  0x3b   : > { %1476 = shalt.err (!%p1473_p2)
}
  0x3c   : > { %1367 = dma.hbm_to_vmem [thread:$0]  (!%p1669_p11), %s1878_s3, 14336, %s1673_s6, [#allocation8], %s1581_s15, %s1581_s15, %s1582_s16  }
  0x3d   : > { %s1734_s29 = sadd.s32 1, %s1577_s21   ;;  %s29_s14 = sadd.s32 1, %s1573_s20 }
  0x3e   : > { %s26_s17 = ssub.s32 %s1577_s21, %s1734_s29  ;;  %p36_p13 = scmp.ne.s32.totalorder %s1573_s20, %s1569_s19 }
  0x3f   : > { %p27_p6 = scmp.eq.s32.totalorder %s26_s17, 0  ;;  %p37_p10 = scmp.eq.s32.totalorder %s1577_s21, 0 }
  0x40   : > { %p1888_p3 = scmp.eq.s32.totalorder %s1639_s22, 1  ;;  %p1378_p7 = scmp.lt.s32.totalorder %s1577_s21, 2 }
  0x41   : > { %s1750_s27 = scalar_select %p27_p6, %s1573_s20, %s29_s14  }
  0x42   : > { %p1744_p5 = por %p1888_p3, %p36_p13  ;;  %p38_p9 = por %p37_p10, %p36_p13 }
  0x43   : > { %s208_s30 = sand.u32 1, %s1573_s20   ;;  %s967_s6 = sshll.u32 %s1577_s21, 8 }
  0x44   : > { %s1889_s23 = scalar_select %p1744_p5, 1, 0 }
  0x45   : > { %s952_s7 = sshll.u32 %s208_s30, 4  ;;  %s1757_s10 = scalar_lea.hbm %s1875_s0, %s967_s6 }
  0x46   : > { %s212_s11 = scalar_lea.vmem [#allocation4], %s952_s7  ;;  %p1761_p11 = pnand %p1378_p7, %p38_p9 }
  0x47   : > { %s219_s28 = sshll.u32 %s212_s11, 4  ;;  %s1765_s13 = scalar_lea.sflag [#allocation5], %s208_s30  ;;  %s1759_s28 = int_to_ptr.vmem [resolvable:$true] %s219_s28 }
  0x48   : > { %s1477_s14 = scalar_lea.hbm %s1757_s10, 256  ;;  %p1479_p0 = pneg %p1761_p11 }
  0x49   : > { %p1478_p12 = scmp.ne.s32.totalorder %s1757_s10, %s1477_s14  ;;  %s1482_s6 = scalar_lea.hbm %s1875_s0, 512 }
  0x4a   : > { %p1483_p13 = scmp.lt.u32.totalorder %s1757_s10, %s1875_s0  ;;  %p1484_p6 = scmp.lt.u32.totalorder %s1482_s6, %s1477_s14 }
  0x4b   : > { %p1480_p1 = pnand %p1479_p0, %p1478_p12  ;;  %p1486_p3 = scmp.lt.u32.totalorder %s1477_s14, %s1757_s10 }
  0x4c   : > { %p1485_p10 = por %p1484_p6, %p1483_p13 }
  0x4d   : > { %p1481_p2 = pneg %p1480_p1 }
  0x4e   : > { %p1487_p7 = por %p1486_p3, %p1485_p10 }
  0x50   : > { %p1488_p9 = pnand %p1487_p7, %p1481_p2 }
  0x52   : > { %1491 = shalt.err (!%p1488_p9)
}
  0x53   : > { %s1492_s30 = scalar_lea.vmem %s1759_s28, 256  ;;  %s1583_s11 = smov [#allocation4]  }
  0x54   : > { %p1493_p12 = scmp.ne.s32.totalorder %s1759_s28, %s1492_s30  ;;  %s1497_s17 = sshll.u32 %s1583_s11, 4  ;;  %s1498_s17 = int_to_ptr.vmem [resolvable:$false] %s1497_s17 }
  0x55   : > { %s1499_s7 = scalar_lea.vmem %s1498_s17, 512  ;;  %p1500_p4 = scmp.lt.s32.totalorder %s1759_s28, %s1498_s17 }
  0x56   : > { %p1495_p1 = pnand %p1493_p12, %p1479_p0  ;;  %p1501_p13 = scmp.lt.s32.totalorder %s1499_s7, %s1492_s30 }
  0x58   : > { %p1496_p5 = pneg %p1495_p1  ;;  %p1502_p6 = por %p1501_p13, %p1500_p4 }
  0x5a   : > { %p1503_p10 = pnand %p1502_p6, %p1496_p5 }
  0x5c   : > { %1506 = shalt.err (!%p1503_p10)
}
  0x5d   : > { %1371 = dma.hbm_to_vmem [thread:$0]  (!%p1761_p11), %s1757_s10, 256, %s1759_s28, %s1765_s13, %s1581_s15, %s1581_s15, %s1582_s16  }
  0x5e   : > { %231 = sbr.rel (%p1658_p8) target bundleno = 634 (0x27a), region = 40  ;;  %s1799_s14 = sand.u32 (!%p1658_p8), 1, %s1569_s19  }
  0x5f   : > { %s956_s6 = sshll.u32 (!%p1658_p8), %s1799_s14, 4  ;;  %s234_s8 = scalar_lea.sflag (!%p1658_p8), [#allocation5], %s1799_s14 }
  0x60   : > { %s1805_s12 = scalar_lea.vmem (!%p1658_p8), [#allocation4], %s956_s6  ;;  %p1891_p4 = scmp.ne.s32.totalorder (!%p1658_p8), %s1884_s24, 0 }
  0x65   : > { %1552 = dma.done.wait (%p1891_p4), %s234_s8, 256  }
  0x66   : > { %1554 = vsyncadd (%p1891_p4), %s234_s8, 4294967040  ;;  %p1892_p5 = scmp.eq.s32.totalorder %s1639_s22, 0 }
  0x68   : > { %1556 = dma.done.wait (%p1892_p5), [#allocation8], 16384   ;;  %p1893_p8 = pmov %p1892_p5 }
  0x69   : > { %v276_v0 = vld [vmem:[#allocation7] sm:$0xff]  ;;  %v277_v1 = vld [vmem:[#allocation7 + $0x8] sm:$0xff]  ;;  %v278_v2 = vld [vmem:[#allocation7 + $0x10] sm:$0xff]  ;;  %s271_s10 = scalar_lea.vmem [#allocation10], %s956_s6  ;;  %s968_s13 = sshll.u32 %s1639_s22, 8 }
  0x6a   : > { %1558 = vsyncadd (%p1893_p8), [#allocation8], 4294950912  ;;  %v1189_v3 = vpack.c.bf16 %v277_v1, %v276_v0  ;;  %v279_v4 = vld [vmem:[#allocation7 + $0x18] sm:$0xff]  ;;  %v280_v6 = vld [vmem:[#allocation7 + $0x20] sm:$0xff]  ;;  %s855_s28 = sshll.u32 %s271_s10, 4  ;;  %s1831_s11 = scalar_lea.hbm %s1880_s5, %s968_s13  ;;  %s1826_s28 = int_to_ptr.vmem [resolvable:$true] %s855_s28 }
  0x6b   : > { %v1193_v5 = vpack.c.bf16 %v279_v4, %v278_v2  ;;  %v281_v7 = vld [vmem:[#allocation7 + $0x28] sm:$0xff]  ;;  %v282_v9 = vld [vmem:[#allocation7 + $0x30] sm:$0xff]  ;;  %v283_v11 = vld [vmem:[#allocation7 + $0x38] sm:$0xff]  ;;  %s842_s17 = scalar_lea.sflag [#allocation6], %s1799_s14  ;;  %s1507_s7 = scalar_lea.vmem %s1826_s28, 256 }
  0x6c   : > { %1190 = vmatprep.subr.bf16.mxu0 %v1189_v3  ;;  %v1197_v8 = vpack.c.bf16 %v281_v7, %v280_v6  ;;  %v274_v10 = vld [vmem:[%s1805_s12] sm:$0xff]  ;;  %v437_v13 = vld [vmem:[#allocation9 + $0x88] sm:$0xff]  ;;  %v1201_v19 = vpack.c.bf16 %v283_v11, %v282_v9  ;;  %v439_v21 = vld [vmem:[#allocation9 + $0x98] sm:$0xff]  ;;  %p1508_p11 = scmp.ne.s32.totalorder %s1826_s28, %s1507_s7  ;;  %p1894_p0 = scmp.ne.s32.totalorder %s1889_s23, 0 }
  0x6d   : > { %1192 = vmatpush3.bf16.msra.mxu0 %v1189_v3  ;;  %1151 = vmatprep.mubr.f32.mxu0 %v274_v10  ;;  %v436_v12 = vld [vmem:[#allocation9 + $0x80] sm:$0xff]  ;;  %v421_v16 = vld [vmem:[#allocation9 + $0x8] sm:$0xff]  ;;  %v438_v18 = vld [vmem:[#allocation9 + $0x90] sm:$0xff]  ;;  %s1585_s22 = smov [#allocation10]  }
  0x6e   : > { %1194 = vmatprep.subr.bf16.mxu0 %v1193_v5  ;;  %v1221_v14 = vpack.c.bf16 %v437_v13, %v436_v12  ;;  %v420_v15 = vld [vmem:[#allocation9] sm:$0xff]  ;;  %v285_v22 = vld [vmem:[#allocation7 + $0x48] sm:$0xff]  ;;  %v1225_v23 = vpack.c.bf16 %v439_v21, %v438_v18  ;;  %v422_v24 = vld [vmem:[#allocation9 + $0x10] sm:$0xff]  ;;  %p1509_p2 = pnand %p1508_p11, %p1894_p0  ;;  %s1511_s6 = sshll.u32 %s1585_s22, 4  ;;  %s1512_s6 = int_to_ptr.vmem [resolvable:$false] %s1511_s6 }
  0x6f   : > { %v1223_v17 = vpack.c.bf16 %v421_v16, %v420_v15  ;;  %v284_v20 = vld [vmem:[#allocation7 + $0x40] sm:$0xff]  ;;  %v423_v25 = vld [vmem:[#allocation9 + $0x18] sm:$0xff]  ;;  %v441_v28 = vld [vmem:[#allocation9 + $0xa8] sm:$0xff]  ;;  %s1513_s8 = scalar_lea.vmem %s1512_s6, 512  ;;  %p1514_p7 = scmp.lt.s32.totalorder %s1826_s28, %s1512_s6 }
  0x70   : > { %1222 = vmatprep.subr.bf16.mxu1 %v1221_v14  ;;  %v1227_v26 = vpack.c.bf16 %v423_v25, %v422_v24  ;;  %v440_v27 = vld [vmem:[#allocation9 + $0xa0] sm:$0xff]  ;;  %v1205_v31 = vpack.c.bf16 %v285_v22, %v284_v20  ;;  %v286_v32 = vld [vmem:[#allocation7 + $0x50] sm:$0xff]  ;;  %v425_v33 = vld [vmem:[#allocation9 + $0x28] sm:$0xff]  ;;  %p1510_p3 = pneg %p1509_p2  ;;  %p1515_p9 = scmp.lt.s32.totalorder %s1513_s8, %s1507_s7 }
  0x71   : > { %1196 = vmatpush3.bf16.msra.mxu0 %v1193_v5  ;;  %1224 = vmatpush3.bf16.msra.mxu1 %v1223_v17  ;;  %v1229_v29 = vpack.c.bf16 %v441_v28, %v440_v27  ;;  %v424_v30 = vld [vmem:[#allocation9 + $0x20] sm:$0xff]  ;;  %v287_v34 = vld [vmem:[#allocation7 + $0x58] sm:$0xff]  ;;  %v442_v36 = vld [vmem:[#allocation9 + $0xb0] sm:$0xff] }
  0x72   : > { %1198 = vmatprep.subr.bf16.mxu0 %v1197_v8  ;;  %1226 = vmatprep.subr.bf16.mxu1 %v1225_v23  ;;  %v1231_v35 = vpack.c.bf16 %v425_v33, %v424_v30  ;;  %v443_v37 = vld [vmem:[#allocation9 + $0xb8] sm:$0xff]  ;;  %v426_v39 = vld [vmem:[#allocation9 + $0x30] sm:$0xff]  ;;  %v444_v41 = vld [vmem:[#allocation9 + $0xc0] sm:$0xff]  ;;  %v1209_v42 = vpack.c.bf16 %v287_v34, %v286_v32  ;;  %p1516_p12 = por %p1515_p9, %p1514_p7 }
  0x73   : > { %v1233_v38 = vpack.c.bf16 %v443_v37, %v442_v36  ;;  %v427_v40 = vld [vmem:[#allocation9 + $0x38] sm:$0xff]  ;;  %v445_v43 = vld [vmem:[#allocation9 + $0xc8] sm:$0xff]  ;;  %v288_v44 = vld [vmem:[#allocation7 + $0x60] sm:$0xff] }
  0x74   : > { %v289_v45 = vld [vmem:[#allocation7 + $0x68] sm:$0xff]  ;;  %v1235_v46 = vpack.c.bf16 %v427_v40, %v426_v39  ;;  %v1237_v47 = vpack.c.bf16 %v445_v43, %v444_v41  ;;  %v428_v48 = vld [vmem:[#allocation9 + $0x40] sm:$0xff]  ;;  %v290_v51 = vld [vmem:[#allocation7 + $0x70] sm:$0xff]  ;;  %p1517_p1 = pnand %p1516_p12, %p1510_p3 }
  0x75   : > { %1200 = vmatpush3.bf16.msra.mxu0 %v1197_v8  ;;  %1228 = vmatpush3.bf16.msra.mxu1 %v1227_v26  ;;  %v429_v49 = vld [vmem:[#allocation9 + $0x48] sm:$0xff]  ;;  %v1213_v50 = vpack.c.bf16 %v289_v45, %v288_v44  ;;  %v291_v52 = vld [vmem:[#allocation7 + $0x78] sm:$0xff]  ;;  %v468_v55 = vld [vmem:[#allocation9 + $0x180] sm:$0xff] }
  0x76   : > { %1202 = vmatprep.subr.bf16.mxu0 %v1201_v19  ;;  %1230 = vmatprep.subr.bf16.mxu1 %v1229_v29  ;;  %v1239_v53 = vpack.c.bf16 %v429_v49, %v428_v48  ;;  %v1217_v54 = vpack.c.bf16 %v291_v52, %v290_v51  ;;  %v469_v56 = vld [vmem:[#allocation9 + $0x188] sm:$0xff]  ;;  %v452_v58 = vld [vmem:[#allocation9 + $0x100] sm:$0xff]  ;;  %v470_v60 = vld [vmem:[#allocation9 + $0x190] sm:$0xff] }
  0x77   : > { %v1253_v57 = vpack.c.bf16 %v469_v56, %v468_v55  ;;  %v453_v59 = vld [vmem:[#allocation9 + $0x108] sm:$0xff]  ;;  %v471_v61 = vld [vmem:[#allocation9 + $0x198] sm:$0xff]  ;;  %v454_v1 = vld [vmem:[#allocation9 + $0x110] sm:$0xff] }
  0x78   : > { %v275_v62 = vld [vmem:[%s1805_s12 + $0x8] sm:$0xff]  ;;  %v1255_v63 = vpack.c.bf16 %v453_v59, %v452_v58  ;;  %v1257_v0 = vpack.c.bf16 %v471_v61, %v470_v60  ;;  %v472_v3 = vld [vmem:[#allocation9 + $0x1a0] sm:$0xff]  ;;  %v474_v9 = vld [vmem:[#allocation9 + $0x1b0] sm:$0xff] }
  0x79   : > { %1204 = vmatpush3.bf16.msra.mxu0 %v1201_v19  ;;  %1232 = vmatpush3.bf16.msra.mxu1 %v1231_v35  ;;  %v455_v2 = vld [vmem:[#allocation9 + $0x118] sm:$0xff]  ;;  %v473_v4 = vld [vmem:[#allocation9 + $0x1a8] sm:$0xff]  ;;  %v456_v7 = vld [vmem:[#allocation9 + $0x120] sm:$0xff] }
  0x7a   : > { %1206 = vmatprep.subr.bf16.mxu0 %v1205_v31  ;;  %1234 = vmatprep.subr.bf16.mxu1 %v1233_v38  ;;  %v1259_v5 = vpack.c.bf16 %v455_v2, %v454_v1  ;;  %v1261_v6 = vpack.c.bf16 %v473_v4, %v472_v3  ;;  %v457_v8 = vld [vmem:[#allocation9 + $0x128] sm:$0xff]  ;;  %v475_v10 = vld [vmem:[#allocation9 + $0x1b8] sm:$0xff]  ;;  %v458_v13 = vld [vmem:[#allocation9 + $0x130] sm:$0xff] }
  0x7b   : > { %v1263_v11 = vpack.c.bf16 %v457_v8, %v456_v7  ;;  %v1265_v12 = vpack.c.bf16 %v475_v10, %v474_v9  ;;  %v459_v14 = vld [vmem:[#allocation9 + $0x138] sm:$0xff]  ;;  %v476_v15 = vld [vmem:[#allocation9 + $0x1c0] sm:$0xff]  ;;  %v477_v16 = vld [vmem:[#allocation9 + $0x1c8] sm:$0xff] }
  0x7c   : > { %v1267_v17 = vpack.c.bf16 %v459_v14, %v458_v13  ;;  %v1269_v18 = vpack.c.bf16 %v477_v16, %v476_v15  ;;  %v460_v19 = vld [vmem:[#allocation9 + $0x140] sm:$0xff]  ;;  %v461_v20 = vld [vmem:[#allocation9 + $0x148] sm:$0xff]  ;;  %v478_v22 = vld [vmem:[#allocation9 + $0x1d0] sm:$0xff] }
  0x7d   : > { %1208 = vmatpush3.bf16.msra.mxu0 %v1205_v31  ;;  %1236 = vmatpush3.bf16.msra.mxu1 %v1235_v46  ;;  %v1271_v21 = vpack.c.bf16 %v461_v20, %v460_v19  ;;  %v479_v23 = vld [vmem:[#allocation9 + $0x1d8] sm:$0xff]  ;;  %v446_v24 = vld [vmem:[#allocation9 + $0xd0] sm:$0xff]  ;;  %v480_v34 = vld [vmem:[#allocation9 + $0x1e0] sm:$0xff]  ;;  %v1584_v46 = vmov 0.0  }
  0x7e   : > { %1210 = vmatprep.subr.bf16.mxu0 %v1209_v42  ;;  %1238 = vmatprep.subr.bf16.mxu1 %v1237_v47  ;;  %v447_v25 = vld [vmem:[#allocation9 + $0xd8] sm:$0xff]  ;;  %v1273_v26 = vpack.c.bf16 %v479_v23, %v478_v22  ;;  %v462_v27 = vld [vmem:[#allocation9 + $0x150] sm:$0xff]  ;;  %v481_v35 = vld [vmem:[#allocation9 + $0x1e8] sm:$0xff]  ;;  %374 = vst [vmem:[#allocation2] sm:$0xff] %v1584_v46 }
  0x7f   : > { %v1241_v28 = vpack.c.bf16 %v447_v25, %v446_v24  ;;  %v430_v29 = vld [vmem:[#allocation9 + $0x50] sm:$0xff]  ;;  %v431_v30 = vld [vmem:[#allocation9 + $0x58] sm:$0xff]  ;;  %v448_v36 = vld [vmem:[#allocation9 + $0xe0] sm:$0xff]  ;;  %v1277_v38 = vpack.c.bf16 %v481_v35, %v480_v34  ;;  %377 = vst [vmem:[#allocation2 + $0x18] sm:$0xff] %v1584_v46 }
  0x80   : > { %v463_v31 = vld [vmem:[#allocation9 + $0x158] sm:$0xff]  ;;  %v1243_v32 = vpack.c.bf16 %v431_v30, %v430_v29  ;;  %v449_v37 = vld [vmem:[#allocation9 + $0xe8] sm:$0xff]  ;;  %v464_v39 = vld [vmem:[#allocation9 + $0x160] sm:$0xff] }
  0x81   : > { %1212 = vmatpush3.bf16.msra.mxu0 %v1209_v42  ;;  %1240 = vmatpush3.bf16.msra.mxu1 %v1239_v53  ;;  %v1275_v33 = vpack.c.bf16 %v463_v31, %v462_v27  ;;  %v1245_v40 = vpack.c.bf16 %v449_v37, %v448_v36  ;;  %v432_v41 = vld [vmem:[#allocation9 + $0x60] sm:$0xff]  ;;  %v433_v42 = vld [vmem:[#allocation9 + $0x68] sm:$0xff]  ;;  %v450_v47 = vld [vmem:[#allocation9 + $0xf0] sm:$0xff] }
  0x82   : > { %1214 = vmatprep.subr.bf16.mxu0 %v1213_v50  ;;  %1242 = vmatprep.subr.bf16.mxu1 %v1241_v28  ;;  %v465_v43 = vld [vmem:[#allocation9 + $0x168] sm:$0xff]  ;;  %v1247_v44 = vpack.c.bf16 %v433_v42, %v432_v41  ;;  %v451_v48 = vld [vmem:[#allocation9 + $0xf8] sm:$0xff]  ;;  %v482_v49 = vld [vmem:[#allocation9 + $0x1f0] sm:$0xff] }
  0x83   : > { %v1279_v45 = vpack.c.bf16 %v465_v43, %v464_v39  ;;  %v483_v51 = vld [vmem:[#allocation9 + $0x1f8] sm:$0xff]  ;;  %v434_v52 = vld [vmem:[#allocation9 + $0x70] sm:$0xff]  ;;  %v516_v59 = vld [vmem:[#allocation9 + $0x300] sm:$0xff] }
  0x84   : > { %v435_v53 = vld [vmem:[#allocation9 + $0x78] sm:$0xff]  ;;  %v466_v56 = vld [vmem:[#allocation9 + $0x170] sm:$0xff]  ;;  %v517_v60 = vld [vmem:[#allocation9 + $0x308] sm:$0xff] }
  0x85   : > { %1216 = vmatpush3.bf16.msra.mxu0 %v1213_v50  ;;  %1244 = vmatpush3.bf16.msra.mxu1 %v1243_v32  ;;  %v1249_v50 = vpack.c.bf16 %v451_v48, %v450_v47  ;;  %v1251_v55 = vpack.c.bf16 %v435_v53, %v434_v52  ;;  %v500_v61 = vld [vmem:[#allocation9 + $0x280] sm:$0xff]  ;;  %v485_v7 = vld [vmem:[#allocation9 + $0x208] sm:$0xff]  ;;  %v502_v8 = vld [vmem:[#allocation9 + $0x290] sm:$0xff] }
  0x86   : > { %1218 = vmatprep.subr.bf16.mxu0 %v1217_v54  ;;  %1246 = vmatprep.subr.bf16.mxu1 %v1245_v40  ;;  %v960_v1 = vld [vmem:[%s1877_s2] ss:$0 sm:$0xff]  ;;  %v503_v9 = vld [vmem:[#allocation9 + $0x298] sm:$0xff]  ;;  %v518_v10 = vld [vmem:[#allocation9 + $0x310] sm:$0xff] }
  0x87   : > { %v486_v13 = vld [vmem:[#allocation9 + $0x210] sm:$0xff]  ;;  %v487_v14 = vld [vmem:[#allocation9 + $0x218] sm:$0xff]  ;;  %v504_v20 = vld [vmem:[#allocation9 + $0x2a0] sm:$0xff] }
  0x88   : > { %v520_v23 = vld [vmem:[#allocation9 + $0x320] sm:$0xff]  ;;  %v521_v24 = vld [vmem:[#allocation9 + $0x328] sm:$0xff]  ;;  %v1291_v25 = vpack.c.bf16 %v487_v14, %v486_v13  ;;  %v522_v30 = vld [vmem:[#allocation9 + $0x330] sm:$0xff] }
  0x89   : > { %1220 = vmatpush3.bf16.msra.mxu0 %v1217_v54  ;;  %1248 = vmatpush3.bf16.msra.mxu1 %v1247_v44  ;;  %v1281_v54 = vpack.c.bf16 %v483_v51, %v482_v49  ;;  %v489_v27 = vld [vmem:[#allocation9 + $0x228] sm:$0xff]  ;;  %v523_v31 = vld [vmem:[#allocation9 + $0x338] sm:$0xff]  ;;  %v506_v34 = vld [vmem:[#allocation9 + $0x2b0] sm:$0xff] }
  0x8a   : > { %1254 = vmatprep.subr.bf16.mxu0 %v1253_v57  ;;  %v467_v57 = vld [vmem:[#allocation9 + $0x178] sm:$0xff]  ;;  %1250 = vmatprep.subr.bf16.mxu1 %v1249_v50  ;;  %v490_v39 = vld [vmem:[#allocation9 + $0x230] sm:$0xff]  ;;  %v524_v42 = vld [vmem:[#allocation9 + $0x340] sm:$0xff] }
  0x8b   : > { %v1283_v58 = vpack.c.bf16 %v467_v57, %v466_v56  ;;  %v507_v35 = vld [vmem:[#allocation9 + $0x2b8] sm:$0xff]  ;;  %v525_v43 = vld [vmem:[#allocation9 + $0x348] sm:$0xff]  ;;  %v508_v44 = vld [vmem:[#allocation9 + $0x2c0] sm:$0xff] }
  0x8c   : > { %1152 = vmatmul.mubr.f32.vlgmr.msra.gmra.mrb[0].mxu0 %v275_v62  ;;  %v501_v62 = vld [vmem:[#allocation9 + $0x288] sm:$0xff]  ;;  %v1297_v40 = vpack.c.bf16 %v507_v35, %v506_v34  ;;  %v491_v41 = vld [vmem:[#allocation9 + $0x238] sm:$0xff]  ;;  %v1333_v47 = vpack.c.bf16 %v525_v43, %v524_v42  ;;  %v492_v48 = vld [vmem:[#allocation9 + $0x240] sm:$0xff] }
  0x8d   : > { %1256 = vmatpush3.bf16.msra.mxu0 %v1255_v63  ;;  %1252 = vmatpush3.bf16.msra.mxu1 %v1251_v55  ;;  %v1317_v63 = vpack.c.bf16 %v517_v60, %v516_v59  ;;  %v1299_v46 = vpack.c.bf16 %v491_v41, %v490_v39  ;;  %v493_v50 = vld [vmem:[#allocation9 + $0x248] sm:$0xff]  ;;  %v526_v51 = vld [vmem:[#allocation9 + $0x350] sm:$0xff]  ;;  %v527_v52 = vld [vmem:[#allocation9 + $0x358] sm:$0xff] }
  0x8e   : > { %1258 = vmatprep.subr.bf16.mxu0 %v1257_v0  ;;  %v1285_v0 = vpack.c.bf16 %v501_v62, %v500_v61  ;;  %v510_v53 = vld [vmem:[#allocation9 + $0x2d0] sm:$0xff]  ;;  %v1303_v55 = vpack.c.bf16 %v493_v50, %v492_v48  ;;  %v1337_v56 = vpack.c.bf16 %v527_v52, %v526_v51  ;;  %v495_v59 = vld [vmem:[#allocation9 + $0x258] sm:$0xff]  ;;  %v528_v60 = vld [vmem:[#allocation9 + $0x360] sm:$0xff] }
  0x8f   : > { %v494_v57 = vld [vmem:[#allocation9 + $0x250] sm:$0xff]  ;;  %v529_v61 = vld [vmem:[#allocation9 + $0x368] sm:$0xff]  ;;  %v512_v62 = vld [vmem:[#allocation9 + $0x2e0] sm:$0xff] }
  0x90   : > { %1286 = vmatprep.subr.bf16.mxu1 %v1285_v0  ;;  %v1307_v0 = vpack.c.bf16 %v495_v59, %v494_v57  ;;  %v499_v13 = vld [vmem:[#allocation9 + $0x278] sm:$0xff] }
  0x91   : > { %1260 = vmatpush3.bf16.msra.mxu0 %v1259_v5 }
  0x92   : > { %1262 = vmatprep.subr.bf16.mxu0 %v1261_v6  ;;  %v484_v6 = vld [vmem:[#allocation9 + $0x200] sm:$0xff] }
  0x95   : > { %1264 = vmatpush3.bf16.msra.mxu0 %v1263_v11  ;;  %v519_v11 = vld [vmem:[#allocation9 + $0x318] sm:$0xff] }
  0x96   : > { %1266 = vmatprep.subr.bf16.mxu0 %v1265_v12  ;;  %v1287_v12 = vpack.c.bf16 %v485_v7, %v484_v6  ;;  %v1321_v19 = vpack.c.bf16 %v519_v11, %v518_v10  ;;  %v531_v6 = vld [vmem:[#allocation9 + $0x378] sm:$0xff]  ;;  %v514_v7 = vld [vmem:[#allocation9 + $0x2f0] sm:$0xff] }
  0x99   : > { %1268 = vmatpush3.bf16.msra.mxu0 %v1267_v17 }
  0x9a   : > { %1270 = vmatprep.subr.bf16.mxu0 %v1269_v18  ;;  %v1289_v18 = vpack.c.bf16 %v503_v9, %v502_v8  ;;  %v515_v8 = vld [vmem:[#allocation9 + $0x2f8] sm:$0xff] }
  0x9b   : > { %v1313_v11 = vpack.c.bf16 %v515_v8, %v514_v7 }
  0x9d   : > { %1272 = vmatpush3.bf16.msra.mxu0 %v1271_v21  ;;  %v505_v21 = vld [vmem:[#allocation9 + $0x2a8] sm:$0xff] }
  0x9e   : > { %1274 = vmatprep.subr.bf16.mxu0 %v1273_v26  ;;  %v488_v26 = vld [vmem:[#allocation9 + $0x220] sm:$0xff]  ;;  %v1293_v29 = vpack.c.bf16 %v505_v21, %v504_v20 }
  0x9f   : > { %v1295_v37 = vpack.c.bf16 %v489_v27, %v488_v26 }
  0xa1   : > { %1276 = vmatpush3.bf16.msra.mxu0 %v1275_v33  ;;  %v1325_v33 = vpack.c.bf16 %v521_v24, %v520_v23 }
  0xa2   : > { %1278 = vmatprep.subr.bf16.mxu0 %v1277_v38  ;;  %v1329_v38 = vpack.c.bf16 %v523_v31, %v522_v30 }
  0xa5   : > { %1280 = vmatpush3.bf16.msra.mxu0 %v1279_v45  ;;  %v509_v45 = vld [vmem:[#allocation9 + $0x2c8] sm:$0xff] }
  0xa6   : > { %1282 = vmatprep.subr.bf16.mxu0 %v1281_v54  ;;  %v1301_v49 = vpack.c.bf16 %v509_v45, %v508_v44  ;;  %v511_v54 = vld [vmem:[#allocation9 + $0x2d8] sm:$0xff] }
  0xa9   : > { %1284 = vmatpush3.bf16.msra.mxu0 %v1283_v58  ;;  %v1305_v58 = vpack.c.bf16 %v511_v54, %v510_v53 }
  0xaa   : > { %1318 = vmatprep.subr.bf16.mxu0 %v1317_v63 }
 0x15f   : > { %v1153_v2 = vpop.f32.mrb[0].mxu0 }
 0x160   : > { %v371_v3 = vadd.f32 %v1153_v2, %v960_v1  ;;  %v365_v4 = vpop.f32.mrb[1].mxu0  ;;  %v496_v2 = vld [vmem:[#allocation9 + $0x260] sm:$0xff] }
 0x161   : > { %v366_v5 = vadd.f32 %v960_v1, %v365_v4  ;;  %v1341_v1 = vpack.c.bf16 %v529_v61, %v528_v60  ;;  %v497_v4 = vld [vmem:[#allocation9 + $0x268] sm:$0xff] }
 0x162   : > { %376 = vst [vmem:[#allocation2 + $0x10] sm:$0xff] %v371_v3  ;;  %v1311_v9 = vpack.c.bf16 %v497_v4, %v496_v2 }
 0x163   : > { %375 = vst [vmem:[#allocation2 + $0x8] sm:$0xff] %v366_v5  ;;  %678 = vmatprep.mubr.f32.mxu0 %v366_v5  ;;  %v530_v5 = vld [vmem:[#allocation9 + $0x370] sm:$0xff] }
 0x164   : > { %v1345_v10 = vpack.c.bf16 %v531_v6, %v530_v5 }
 0x16a   : > { %v382_v15 = vld [vmem:[#allocation2 + $0x6] sm:$0xff]  ;;  %v383_v22 = vld [vmem:[#allocation2 + $0xe] sm:$0xff] }
 0x16b   : > { %v378_v16 = vld [vmem:[#allocation2 + $0x4] sm:$0xff]  ;;  %603 = vmatprep.mubr.f32.mxu1 %v382_v15  ;;  %v387_v28 = vld [vmem:[#allocation2 + $0xf] sm:$0xff] }
 0x16c   : > { %v386_v17 = vld [vmem:[#allocation2 + $0x7] sm:$0xff]  ;;  %604 = vmatmul.mubr.f32.vlgmr.msra.gmra.mrb[0].mxu1 %v378_v16  ;;  %v403_v15 = vld [vmem:[#allocation2 + $0x14] sm:$0xff] }
 0x16d   : > { %679 = vmatmul.mubr.f32.vlgmr.msra.gmra.mrb[2].mxu0 %v386_v17  ;;  %1288 = vmatpush3.bf16.msra.mxu1 %v1287_v12  ;;  %v379_v32 = vld [vmem:[#allocation2 + $0xc] sm:$0xff] }
 0x16e   : > { %1320 = vmatpush3.bf16.msra.mxu0 %v1317_v63  ;;  %608 = vmatprep.mubr.f32.mxu1 %v383_v22  ;;  %v398_v36 = vld [vmem:[#allocation2 + $0xa] sm:$0xff]  ;;  %v399_v17 = vld [vmem:[#allocation2 + $0x12] sm:$0xff]  ;;  %v961_v22 = vld [vmem:[%s1879_s4] ss:$0 sm:$0xff] }
 0x16f   : > { %683 = vmatprep.mubr.f32.mxu0 %v371_v3  ;;  %1290 = vmatprep.subr.bf16.mxu1 %v1289_v18  ;;  %v513_v63 = vld [vmem:[#allocation9 + $0x2e8] sm:$0xff]  ;;  %v498_v12 = vld [vmem:[#allocation9 + $0x270] sm:$0xff] }
 0x170   : > { %1322 = vmatprep.subr.bf16.mxu0 %v1321_v19  ;;  %609 = vmatmul.mubr.f32.gmra.mrb[2].mxu1 %v379_v32  ;;  %v1309_v3 = vpack.c.bf16 %v513_v63, %v512_v62  ;;  %v1315_v14 = vpack.c.bf16 %v499_v13, %v498_v12  ;;  %v394_v16 = vld [vmem:[#allocation2 + $0x9] sm:$0xff]  ;;  %v395_v18 = vld [vmem:[#allocation2 + $0x11] sm:$0xff] }
 0x171   : > { %684 = vmatmul.mubr.f32.gmra.mrb[4].mxu0 %v387_v28  ;;  %1292 = vmatpush3.bf16.msra.mxu1 %v1291_v25 }
 0x172   : > { %1324 = vmatpush3.bf16.msra.mxu0 %v1321_v19  ;;  %753 = vmatprep.mubr.f32.mxu1 %v398_v36 }
 0x173   : > { %1186 = vmatprep.mubr.f32.mxu0 %v379_v32  ;;  %1294 = vmatprep.subr.bf16.mxu1 %v1293_v29 }
 0x174   : > { %1326 = vmatprep.subr.bf16.mxu0 %v1325_v33 }
 0x175   : > { %1296 = vmatpush3.bf16.msra.mxu1 %v1295_v37 }
 0x176   : > { %1328 = vmatpush3.bf16.msra.mxu0 %v1325_v33  ;;  %1298 = vmatprep.subr.bf16.mxu1 %v1297_v40 }
 0x177   : > { %1330 = vmatprep.subr.bf16.mxu0 %v1329_v38 }
 0x179   : > { %1300 = vmatpush3.bf16.msra.mxu1 %v1299_v46 }
 0x17a   : > { %1332 = vmatpush3.bf16.msra.mxu0 %v1329_v38  ;;  %1302 = vmatprep.subr.bf16.mxu1 %v1301_v49 }
 0x17b   : > { %1334 = vmatprep.subr.bf16.mxu0 %v1333_v47 }
 0x17d   : > { %1304 = vmatpush3.bf16.msra.mxu1 %v1303_v55 }
 0x17e   : > { %1336 = vmatpush3.bf16.msra.mxu0 %v1333_v47  ;;  %1306 = vmatprep.subr.bf16.mxu1 %v1305_v58 }
 0x17f   : > { %1338 = vmatprep.subr.bf16.mxu0 %v1337_v56 }
 0x181   : > { %1308 = vmatpush3.bf16.msra.mxu1 %v1307_v0 }
 0x182   : > { %1340 = vmatpush3.bf16.msra.mxu0 %v1337_v56  ;;  %1310 = vmatprep.subr.bf16.mxu1 %v1309_v3 }
 0x183   : > { %1342 = vmatprep.subr.bf16.mxu0 %v1341_v1 }
 0x185   : > { %1312 = vmatpush3.bf16.msra.mxu1 %v1311_v9 }
 0x186   : > { %1344 = vmatpush3.bf16.msra.mxu0 %v1341_v1  ;;  %1314 = vmatprep.subr.bf16.mxu1 %v1313_v11 }
 0x187   : > { %1346 = vmatprep.subr.bf16.mxu0 %v1345_v10 }
 0x189   : > { %1316 = vmatpush3.bf16.msra.mxu1 %v1315_v14 }
 0x18a   : > { %1348 = vmatpush3.bf16.msra.mxu0 %v1345_v10 }
 0x18c   : > { %754 = vmatmul.mubr.f32.vlgmr.msra.gmra.mrb[4].mxu1 %v394_v16 }
 0x18d   : > { %1187 = vmatmul.mubr.f32.vlgmr.msra.gmra.mrb[6].mxu0 %v403_v15  ;;  %758 = vmatprep.mubr.f32.mxu1 %v399_v17 }
 0x190   : > { %759 = vmatmul.mubr.f32.gmra.mrb[6].mxu1 %v395_v18 }
 0x23f   : > { %v1019_v20 = vpop.f32.mrb[0].mxu1 }
 0x240   : > { %v1057_v19 = vpop.f32.mrb[2].mxu0  ;;  %v1020_v23 = vpop.f32.mrb[1].mxu1 }
 0x241   : > { %v1058_v21 = vpop.f32.mrb[3].mxu0  ;;  %v1021_v25 = vadd.f32 %v1020_v23, %v1019_v20 }
 0x242   : > { %v1059_v24 = vadd.f32 %v1058_v21, %v1057_v19 }
 0x243   : > { %v606_v27 = vadd.f32 %v1021_v25, %v961_v22  ;;  %v1022_v28 = vpop.f32.mrb[2].mxu1 }
 0x244   : > { %v1060_v26 = vpop.f32.mrb[4].mxu0  ;;  %v1023_v30 = vpop.f32.mrb[3].mxu1 }
 0x245   : > { %v1061_v29 = vpop.f32.mrb[5].mxu0  ;;  %v681_v32 = vadd.f32 %v1059_v24, %v606_v27  ;;  %v1024_v33 = vadd.f32 %v1023_v30, %v1022_v28 }
 0x246   : > { %v1062_v31 = vadd.f32 %v1061_v29, %v1060_v26 }
 0x247   : > { %v611_v34 = vadd.f32 %v1024_v33, %v961_v22 }
 0x249   : > { %v686_v35 = vadd.f32 %v1062_v31, %v611_v34 }
 0x25f   : > { %v1095_v37 = vpop.f32.mrb[4].mxu1 }
 0x260   : > { %v1188_v36 = vpop.f32.mrb[6].mxu0  ;;  %v1096_v39 = vpop.f32.mrb[5].mxu1 }
 0x261   : > { %v830_v38 = vpop.f32.mrb[7].mxu0  ;;  %v1097_v40 = vadd.f32 %v1096_v39, %v1095_v37 }
 0x263   : > { %v756_v41 = vadd.f32 %v1097_v40, %v681_v32  ;;  %v1098_v42 = vpop.f32.mrb[6].mxu1 }
 0x264   : > { %v1099_v43 = vpop.f32.mrb[7].mxu1 }
 0x265   : > { %v831_v44 = vadd.f32 %v830_v38, %v756_v41  ;;  %v1100_v45 = vadd.f32 %v1099_v43, %v1098_v42 }
 0x267   : > { %839 = vst [vmem:[%s271_s10] sm:$0xff] %v831_v44  ;;  %v761_v46 = vadd.f32 %v1100_v45, %v686_v35 }
 0x269   : > { %v836_v47 = vadd.f32 %v1188_v36, %v761_v46 }
 0x26b   : > { %840 = vst [vmem:[%s271_s10 + $0x8] sm:$0xff] %v836_v47 }
 0x26c   : > { %1520 = shalt.err (!%p1517_p1)
}
 0x26d   : > { %s1521_s12 = scalar_lea.hbm %s1831_s11, 256  ;;  %s1525_s15 = scalar_lea.hbm %s1880_s5, 512 }
 0x26e   : > { %p1522_p13 = scmp.ne.s32.totalorder %s1831_s11, %s1521_s12  ;;  %p1526_p4 = scmp.lt.u32.totalorder %s1831_s11, %s1880_s5 }
 0x26f   : > { %p1527_p5 = scmp.lt.u32.totalorder %s1525_s15, %s1521_s12  ;;  %p1529_p11 = scmp.lt.u32.totalorder %s1521_s12, %s1831_s11 }
 0x270   : > { %p1523_p6 = pnand %p1522_p13, %p1894_p0 }
 0x271   : > { %p1528_p8 = por %p1527_p5, %p1526_p4 }
 0x272   : > { %p1524_p10 = pneg %p1523_p6 }
 0x273   : > { %p1530_p2 = por %p1529_p11, %p1528_p8 }
 0x275   : > { %p1531_p3 = pnand %p1530_p2, %p1524_p10 }
 0x277   : > { %1534 = shalt.err (!%p1531_p3)
}
 0x278   : > { %s1586_s13 = smov 128   ;;  %s1587_s9 = smov 8  }
 0x279   : > { %1359 = dma.vmem_to_hbm [thread:$0]  (%p1894_p0), %s1826_s28, 256, %s1831_s11, %s842_s17, %s1586_s13, %s1586_s13, %s1587_s9  }
 0x27a PF: > { %s870_s30 = sand.u32 1, %s1565_s18   ;;  %p1895_p7 = scmp.ne.s32.totalorder %s1885_s25, 0 }
 0x27b   : > { %p1896_p9 = scmp.ge.s32.totalorder %s1577_s21, 2  ;;  %s871_s7 = scalar_lea.sflag [#allocation6], %s870_s30 }
 0x27d   : > { %p1373_p12 = pnand %p1896_p9, %p1895_p7 }
 0x27f   : > { %1560 = dma.done.wait (!%p1373_p12), %s871_s7, 256  }
 0x280   : > { %1562 = vsyncadd (!%p1373_p12), %s871_s7, 4294967040  ;;  %p19_p1 = scmp.ge.s32.totalorder %s1734_s29, 4   ;;  %s1897_s18 = smov %s1569_s19 }
 0x281   : > { %s1898_s19 = smov %s1573_s20  ;;  %s1899_s20 = smov %s1750_s27 }
 0x282   : > { %s1900_s21 = smov %s1734_s29  ;;  %21 = sbr.rel (!%p19_p1) target bundleno = 6 (0x6), region = 93 }
 0x289   :  { %876 = vsyncpa [#allocation5], 1 }
 0x28a   :  { %878 = vsyncpa [#allocation5 + $0x1], 1 }
 0x28b   :  { %879 = vsyncpa [#allocation8], 1 }
 0x28c   :  { %880 = vsyncpa [#allocation6], 1 }
 0x28d   :  { %882 = vsyncpa [#allocation6 + $0x1], 1 }

</bundles_post_ra>
